<compile_context>
chip_gen: v6e
topology: v6e:2x2x1
jax: 0.10.0
libtpu: 0.0.40
codegen_flags: <defaults>
</compile_context>

<pallas_src>
import functools

import jax
import jax.numpy as jnp
from jax import lax
from jax.experimental import pallas as pl
from jax.experimental.pallas import tpu as pltpu


def _round_up(x, m):
    return (x + m - 1) // m * m


def _vmem_capacity_bytes():
    """Best-effort per-core VMEM capacity; falls back to v7x's 64 MiB."""
    try:
        return int(pltpu.get_tpu_info().vmem_capacity_bytes)
    except Exception:
        return 64 * 1024 * 1024


def _patch_embed_kernel(x_ref, w_ref, p_ref, o_ref, *, eps, inv_d, n_pad):
    """o = LayerNorm(x @ W + b) * gamma + beta (f32 accumulation/epilogue).

    x_ref: (tm, K) compute dtype; w_ref: (K, Dp) compute dtype;
    p_ref: (3, Dp) f32 rows = [bias, gamma, beta]; o_ref: (tm, Dp) out dtype.
    """
    acc = jnp.dot(x_ref[...], w_ref[...], preferred_element_type=jnp.float32)
    acc = acc + p_ref[0:1, :]                     # bias (padded lanes are zero)

    # LayerNorm over the true embed dim D (inv_d = 1/D).  Padded lanes of acc
    # are exactly zero (zero weight columns + zero bias), so sum(acc) already
    # equals the sum over the real D.  For the variance, each padded lane
    # contributes exactly mean^2 to sum(centered^2); subtract that closed-form
    # correction instead of building a per-tile iota/where lane mask.
    mean = jnp.sum(acc, axis=-1, keepdims=True) * inv_d
    centered = acc - mean
    sumsq = jnp.sum(centered * centered, axis=-1, keepdims=True)
    if n_pad:
        sumsq = sumsq - float(n_pad) * (mean * mean)
    normed = centered * lax.rsqrt(sumsq * inv_d + eps)
    o_ref[...] = (normed * p_ref[1:2, :] + p_ref[2:3, :]).astype(o_ref.dtype)


def patch_embedding(x, w_conv, b_conv, gamma, beta, *, patch_size, eps=1e-5,
                    compute_dtype=jnp.bfloat16, out_dtype=None, tm_target=None):
    """x: (B, C, H, W) NCHW.  Returns (B, N, D), N = (H//P) * (W//P)."""
    B, C, H, W = x.shape
    P = patch_size
    D = w_conv.shape[0]
    Hp, Wp = H // P, W // P
    N = Hp * Wp
    K = C * P * P
    M = B * N
    if out_dtype is None:
        out_dtype = compute_dtype

    # Lane-dense embed dim: pad D up to a multiple of 128 (no-op if already).
    Dp = max(_round_up(D, 128), 128)
    n_pad = Dp - D

    in_bytes = jnp.dtype(compute_dtype).itemsize
    out_bytes = jnp.dtype(out_dtype).itemsize
    row_align = 8 * max(1, 4 // in_bytes)          # 8 rows f32, 16 rows bf16

    # Generation-aware VMEM policy (v5e/v6e: 128 MiB; v7x: 64 MiB per core).
    vmem_cap = _vmem_capacity_bytes()
    big_vmem = vmem_cap >= 96 * 1024 * 1024
    vmem_limit = min(int(vmem_cap * 0.85), 110 * 1024 * 1024)
    vmem_budget = int(vmem_cap * 0.45)
    if tm_target is None:
        tm_target = 1024 if big_vmem else 512

    def footprint(t):
        return (2 * t * K * in_bytes          # patch-row tiles (double buffered)
                + K * Dp * in_bytes           # weight (Buffered(1), constant)
                + 3 * Dp * 4                  # packed bias / gamma / beta
                + 2 * t * Dp * out_bytes      # output tiles (double buffered)
                + 3 * t * Dp * 4)             # f32 LayerNorm temporaries

    tm = max(row_align,
             min(_round_up(tm_target, row_align), _round_up(M, row_align)))
    while tm > row_align and footprint(tm) > vmem_budget:
        tm = max(row_align, _round_up(tm // 2, row_align))
    # Megacore guard: give a 2-TC chip at least two grid steps to shard.
    if pl.cdiv(M, tm) < 2 and M > row_align:
        tm = max(row_align, _round_up(pl.cdiv(M, 2), row_align))
    grid_m = pl.cdiv(M, tm)

    # Unfold NCHW image into patch rows; feature order (c, ph, pw) matches the
    # Conv2d weight layout (D, C, P, P).  Cast before the transpose so the one
    # materialized copy (cast + transpose + reshape fuse in XLA) is in the
    # compute dtype.  No M padding (ragged last block handled by Pallas).
    # TODO(synk): move the unfold into the kernel (DMA (C, P, Wp*P) slabs per
    # (b, hp) and rearrange in VMEM) to remove this extra HBM pass entirely.
    patches = (x.astype(compute_dtype)
               .reshape(B, C, Hp, P, Wp, P)
               .transpose(0, 2, 4, 1, 3, 5)       # (B, Hp, Wp, C, P, P)
               .reshape(M, K))

    # Conv weight (D, C, P, P) -> matmul weight (K, Dp); padded lanes are zero.
    w_mat = w_conv.reshape(D, K).T.astype(compute_dtype)
    if n_pad:
        w_mat = jnp.pad(w_mat, ((0, 0), (0, n_pad)))

    # bias / gamma / beta packed into a single (3, Dp) f32 operand.
    params = jnp.stack([b_conv, gamma, beta]).astype(jnp.float32)
    if n_pad:
        params = jnp.pad(params, ((0, 0), (0, n_pad)))

    def _const_spec(shape):
        # Constant-index operands: fetched once; single-buffer to save VMEM.
        try:
            return pl.BlockSpec(shape, lambda i: (0, 0),
                                pipeline_mode=pl.Buffered(1))
        except TypeError:  # older BlockSpec without pipeline_mode
            return pl.BlockSpec(shape, lambda i: (0, 0))

    kernel = functools.partial(_patch_embed_kernel, eps=float(eps),
                               inv_d=1.0 / float(D), n_pad=n_pad)

    out = pl.pallas_call(
        kernel,
        out_shape=jax.ShapeDtypeStruct((M, Dp), out_dtype),
        grid_spec=pltpu.PrefetchScalarGridSpec(
            num_scalar_prefetch=0,
            grid=(grid_m,),
            in_specs=[
                pl.BlockSpec((tm, K), lambda i: (i, 0)),   # patch row tile
                _const_spec((K, Dp)),                      # weight (constant)
                _const_spec((3, Dp)),                      # bias/gamma/beta
            ],
            out_specs=pl.BlockSpec((tm, Dp), lambda i: (i, 0)),
        ),
        compiler_params=pltpu.CompilerParams(
            dimension_semantics=("parallel",),
            vmem_limit_bytes=int(vmem_limit),
        ),
    )(patches, w_mat, params)

    if n_pad:
        out = out[:, :D]
    return out.reshape(B, N, D)


def _reference(x, w_conv, b_conv, gamma, beta, *, patch_size, eps=1e-5):
    # Pure-JAX reference: strided conv + LayerNorm, NCHW like PyTorch.
    y = lax.conv_general_dilated(
        x, w_conv,
        window_strides=(patch_size, patch_size),
        padding="VALID",
        dimension_numbers=("NCHW", "OIHW", "NCHW"),
    ) + b_conv[None, :, None, None]
    B, D, Hp, Wp = y.shape
    y = y.reshape(B, D, Hp * Wp).transpose(0, 2, 1)  # (B, N, D)
    mean = jnp.mean(y, axis=-1, keepdims=True)
    var = jnp.mean((y - mean) ** 2, axis=-1, keepdims=True)
    return (y - mean) * lax.rsqrt(var + eps) * gamma + beta


if __name__ == "__main__":
    # Small config consistent with the module: img 16x16, patch 4, C=4, D=32.
    img_size, patch_size, in_channels, embed_dim = 16, 4, 4, 32
    B = 2

    key = jax.random.PRNGKey(0)
    kx, kw, kb = jax.random.split(key, 3)

    x = jax.random.normal(kx, (B, in_channels, img_size, img_size), jnp.float32)
    w_conv = jax.random.normal(
        kw, (embed_dim, in_channels, patch_size, patch_size), jnp.float32) * 0.05
    b_conv = jax.random.normal(kb, (embed_dim,), jnp.float32) * 0.05
    gamma = jnp.ones((embed_dim,), jnp.float32)
    beta = jnp.zeros((embed_dim,), jnp.float32)

    ref = _reference(x, w_conv, b_conv, gamma, beta, patch_size=patch_size)
    n_patches = (img_size // patch_size) ** 2

    # f32 compute + f32 output: tight check vs the conv + LayerNorm reference.
    out_f32 = patch_embedding(x, w_conv, b_conv, gamma, beta,
                              patch_size=patch_size,
                              compute_dtype=jnp.float32,
                              out_dtype=jnp.float32)
    out_f32 = jax.block_until_ready(out_f32)
    assert out_f32.shape == (B, n_patches, embed_dim)
    assert jnp.allclose(out_f32, ref, atol=1e-3, rtol=1e-3), "f32 mismatch vs reference"

    # Default path: bf16 compute, bf16 output (half HBM traffic); loose check.
    out_bf16 = patch_embedding(x, w_conv, b_conv, gamma, beta,
                               patch_size=patch_size)
    out_bf16 = jax.block_until_ready(out_bf16)
    assert out_bf16.shape == (B, n_patches, embed_dim)
    assert out_bf16.dtype == jnp.bfloat16
    assert jnp.allclose(out_bf16.astype(jnp.float32), ref,
                        atol=1e-1, rtol=1e-1), "bf16 mismatch vs reference"

    print("KERNEL_OK")
</pallas_src>

<mosaic_0001>
module attributes {stable_mosaic.version = 11 : i64} {
  func.func @_patch_embed_kernel(%arg0: i32, %arg1: memref<16x64xf32, #tpu.memory_space<vmem>>, %arg2: memref<64x128xf32, #tpu.memory_space<vmem>>, %arg3: memref<3x128xf32, #tpu.memory_space<vmem>>, %arg4: memref<16x128xf32, #tpu.memory_space<vmem>>) attributes {dimension_semantics = [#tpu.dimension_semantics<parallel>], iteration_bounds = array<i64: 2>, scalar_prefetch = 0 : i64, scratch_operands = 0 : i64, tpu.core_type = #tpu.core_type<tc>, window_params = [{transform_indices = @transform_0, window_bounds = array<i64: 16, 64>}, {pipeline_mode = #tpu.pipeline_mode<synchronous>, transform_indices = @transform_1, window_bounds = array<i64: 64, 128>}, {pipeline_mode = #tpu.pipeline_mode<synchronous>, transform_indices = @transform_2, window_bounds = array<i64: 3, 128>}, {transform_indices = @transform_3, window_bounds = array<i64: 16, 128>}]} {
    %c0 = arith.constant 0 : index
    %c0_0 = arith.constant 0 : index
    %0 = vector.load %arg1[%c0, %c0_0] : memref<16x64xf32, #tpu.memory_space<vmem>>, vector<16x64xf32>
    %c0_1 = arith.constant 0 : index
    %c0_2 = arith.constant 0 : index
    %1 = vector.load %arg2[%c0_1, %c0_2] : memref<64x128xf32, #tpu.memory_space<vmem>>, vector<64x128xf32>
    %cst = arith.constant dense<0.000000e+00> : vector<16x128xf32>
    %2 = tpu.matmul %0, %1, %cst {dimension_numbers = #tpu.dot_dimension_numbers<[1], [0], [0], [1], [0, 0, 1, 1], [], []>} : vector<16x64xf32>, vector<64x128xf32>, vector<16x128xf32> -> vector<16x128xf32>
    %c0_3 = arith.constant 0 : index
    %c0_4 = arith.constant 0 : index
    %3 = vector.load %arg3[%c0_3, %c0_4] : memref<3x128xf32, #tpu.memory_space<vmem>>, vector<1x128xf32>
    %4 = vector.broadcast %3 : vector<1x128xf32> to vector<16x128xf32>
    %5 = arith.addf %2, %4 : vector<16x128xf32>
    %cst_5 = arith.constant dense<0.000000e+00> : vector<16xf32>
    %6 = vector.multi_reduction <add>, %5, %cst_5 [1] : vector<16x128xf32> to vector<16xf32>
    %7 = vector.shape_cast %6 : vector<16xf32> to vector<16x1xf32>
    %cst_6 = arith.constant 3.125000e-02 : f32
    %8 = vector.broadcast %cst_6 : f32 to vector<16x1xf32>
    %9 = arith.mulf %7, %8 : vector<16x1xf32>
    %10 = vector.broadcast %9 : vector<16x1xf32> to vector<16x128xf32>
    %11 = arith.subf %5, %10 : vector<16x128xf32>
    %12 = arith.mulf %11, %11 : vector<16x128xf32>
    %cst_7 = arith.constant dense<0.000000e+00> : vector<16xf32>
    %13 = vector.multi_reduction <add>, %12, %cst_7 [1] : vector<16x128xf32> to vector<16xf32>
    %14 = vector.shape_cast %13 : vector<16xf32> to vector<16x1xf32>
    %15 = arith.mulf %9, %9 : vector<16x1xf32>
    %cst_8 = arith.constant 9.600000e+01 : f32
    %16 = vector.broadcast %cst_8 : f32 to vector<16x1xf32>
    %17 = arith.mulf %16, %15 : vector<16x1xf32>
    %18 = arith.subf %14, %17 : vector<16x1xf32>
    %cst_9 = arith.constant 3.125000e-02 : f32
    %19 = vector.broadcast %cst_9 : f32 to vector<16x1xf32>
    %20 = arith.mulf %18, %19 : vector<16x1xf32>
    %cst_10 = arith.constant 9.99999974E-6 : f32
    %21 = vector.broadcast %cst_10 : f32 to vector<16x1xf32>
    %22 = arith.addf %20, %21 : vector<16x1xf32>
    %23 = math.rsqrt %22 : vector<16x1xf32>
    %24 = vector.broadcast %23 : vector<16x1xf32> to vector<16x128xf32>
    %25 = arith.mulf %11, %24 : vector<16x128xf32>
    %c1 = arith.constant 1 : index
    %c0_11 = arith.constant 0 : index
    %26 = vector.load %arg3[%c1, %c0_11] : memref<3x128xf32, #tpu.memory_space<vmem>>, vector<1x128xf32>
    %27 = vector.broadcast %26 : vector<1x128xf32> to vector<16x128xf32>
    %28 = arith.mulf %25, %27 : vector<16x128xf32>
    %c2 = arith.constant 2 : index
    %c0_12 = arith.constant 0 : index
    %29 = vector.load %arg3[%c2, %c0_12] : memref<3x128xf32, #tpu.memory_space<vmem>>, vector<1x128xf32>
    %30 = vector.broadcast %29 : vector<1x128xf32> to vector<16x128xf32>
    %31 = arith.addf %28, %30 : vector<16x128xf32>
    %c0_13 = arith.constant 0 : index
    %c0_14 = arith.constant 0 : index
    %32 = vector.load %arg4[%c0_13, %c0_14] : memref<16x128xf32, #tpu.memory_space<vmem>>, vector<16x128xf32>
    tpu.vector_store %arg4[%c0_13, %c0_14], %31 {strides = array<i32>} : memref<16x128xf32, #tpu.memory_space<vmem>>, vector<16x128xf32>,
    return
  }
  func.func @transform_0(%arg0: i32) -> (i32, i32) {
    %c0_i32 = arith.constant 0 : i32
    %c0_i32_0 = arith.constant 0 : i32
    return %arg0, %c0_i32 : i32, i32
  }
  func.func @transform_1(%arg0: i32) -> (i32, i32) {
    %c0_i32 = arith.constant 0 : i32
    %c0_i32_0 = arith.constant 0 : i32
    %c0_i32_1 = arith.constant 0 : i32
    return %c0_i32, %c0_i32_0 : i32, i32
  }
  func.func @transform_2(%arg0: i32) -> (i32, i32) {
    %c0_i32 = arith.constant 0 : i32
    %c0_i32_0 = arith.constant 0 : i32
    %c0_i32_1 = arith.constant 0 : i32
    return %c0_i32, %c0_i32_0 : i32, i32
  }
  func.func @transform_3(%arg0: i32) -> (i32, i32) {
    %c0_i32 = arith.constant 0 : i32
    %c0_i32_0 = arith.constant 0 : i32
    return %arg0, %c0_i32 : i32, i32
  }
}

</mosaic_0001>

<bundles_post_ra>
// kernel: tpu_custom_call.1
= control target key start
LH: loop header
LB: loop body
LE: loop exit
PB: predicated region body
PF: predicated region fallthrough
CT: control target
= control target key end

     0   :  { %8 = vsyncpa [#allocation3], 0  ;;  %s972_s0 = inlined_call_operand.hbm [shape: f32[32,64], index: 0, kind: input, shape index: {}]   ;;  %s973_s1 = inlined_call_operand.hbm [shape: f32[64,128], index: 1, kind: input, shape index: {}]   ;;  %s974_s2 = inlined_call_operand.hbm [shape: f32[3,128], index: 2, kind: input, shape index: {}]   ;;  %s975_s3 = inlined_call_operand.hbm [shape: f32[32,128], index: 3, kind: output, shape index: {}]  }
   0x1   :  { %10 = vsyncpa [#allocation3 + $0x1], 0 }
   0x2   :  { %11 = vsyncpa [#allocation6], 0 }
   0x3   :  { %12 = vsyncpa [#allocation4], 0 }
   0x4   :  { %14 = vsyncpa [#allocation4 + $0x1], 0  ;;  %s772_s12 = smov 0   ;;  %s774_s13 = smov 0  }
   0x5   :  { %s776_s14 = smov 0   ;;  %s778_s15 = smov 0  }
   0x6 LB: > { %s793_s16 = sadd.s32 4294967295, %s742_s15   ;;  %s465_s17 = sadd.s32 4294967294, %s742_s15   ;;  %s742_s15 = sphi %s778_s15, %s996_s15   ;;  %s738_s14 = sphi %s776_s14, %s995_s14   ;;  %s734_s13 = sphi %s774_s13, %s994_s13   ;;  %s730_s12 = sphi %s772_s12, %s993_s12  }
   0x7   : > { %p40_p0 = scmp.ne.s32.totalorder %s734_s13, %s730_s12  ;;  %p976_p1 = scmp.eq.s32.totalorder %s793_s16, 0 }
   0x8   : > { %p106_p2 = scmp.eq.s32.totalorder %s793_s16, 1  ;;  %p112_p3 = scmp.eq.s32.totalorder %s465_s17, 1 }
   0x9   : > { %p802_p4 = por %p976_p1, %p40_p0  ;;  %p466_p5 = scmp.ge.s32.totalorder %s742_s15, 1 }
   0xa   : > { %p807_p6 = por %p112_p3, %p40_p0  ;;  %p119_p7 = scmp.lt.s32.totalorder %s742_s15, 3 }
   0xb   : > { %s980_s18 = scalar_select %p802_p4, 1, 0 }
   0xc   : > { %s981_s19 = scalar_select %p807_p6, 1, 0 }
   0xd   : > { %p812_p8 = pnand %p466_p5, %p119_p7  ;;  %s744_s21 = smov [#allocation5]  }
   0xe   : > { %s131_s22 = sshll.u32 %s744_s21, 4  ;;  %s745_s24 = smov [#allocation7]   ;;  %s132_s22 = int_to_ptr.vmem [resolvable:$true] %s131_s22 }
   0xf   : > { %s982_s20 = scalar_select %p812_p8, 1, 0 }
  0x10   : > { %p531_p9 = pneg %p812_p8  ;;  %s145_s25 = sshll.u32 %s745_s24, 4  ;;  %s146_s25 = int_to_ptr.vmem [resolvable:$true] %s145_s25 }
  0x11   : > { %s605_s26 = scalar_lea.vmem %s132_s22, 1024  ;;  %p613_p5 = scmp.lt.s32.totalorder %s132_s22, %s132_s22 }
  0x12   : > { %p821_p11 = pnand %p531_p9, %p976_p1  ;;  %p606_p13 = scmp.ne.s32.totalorder %s132_s22, %s605_s26 }
  0x13   : > { %p614_p7 = scmp.lt.s32.totalorder %s605_s26, %s605_s26 }
  0x14   : > { %p596_p12 = pneg %p821_p11 }
  0x15   : > { %p615_p10 = por %p614_p7, %p613_p5 }
  0x16   : > { %p608_p0 = pnand %p606_p13, %p596_p12 }
  0x18   : > { %p609_p3 = pneg %p608_p0 }
  0x1a   : > { %p616_p9 = pnand %p615_p10, %p609_p3 }
  0x1c   : > { %619 = shalt.err (!%p616_p9)
}
  0x1d   : > { %s746_s27 = smov 128   ;;  %s747_s28 = smov 8  }
  0x1e   : > { %534 = dma.hbm_to_vmem [thread:$0]  (!%p821_p11), %s973_s1, 1024, %s132_s22, [#allocation6], %s746_s27, %s746_s27, %s747_s28  }
  0x1f   : > { %s631_s4 = scalar_lea.vmem %s146_s25, 64  ;;  %p639_p10 = scmp.lt.s32.totalorder %s146_s25, %s146_s25 }
  0x20   : > { %p632_p13 = scmp.ne.s32.totalorder %s146_s25, %s631_s4  ;;  %p640_p3 = scmp.lt.s32.totalorder %s631_s4, %s631_s4 }
  0x22   : > { %p634_p0 = pnand %p632_p13, %p596_p12  ;;  %p641_p7 = por %p640_p3, %p639_p10 }
  0x24   : > { %p635_p5 = pneg %p634_p0 }
  0x26   : > { %p642_p9 = pnand %p641_p7, %p635_p5 }
  0x28   : > { %645 = shalt.err (!%p642_p9)
}
  0x29   : > { %537 = dma.hbm_to_vmem [thread:$0]  (!%p821_p11), %s974_s2, 64, %s146_s25, [#allocation6]  }
  0x2a   : > { %s847_s7 = sadd.s32 1, %s742_s15   ;;  %s27_s8 = sadd.s32 1, %s738_s14 }
  0x2b   : > { %s24_s9 = ssub.s32 %s742_s15, %s847_s7  ;;  %p34_p12 = scmp.ne.s32.totalorder %s738_s14, %s734_s13 }
  0x2c   : > { %p25_p13 = scmp.eq.s32.totalorder %s24_s9, 0  ;;  %p35_p0 = scmp.eq.s32.totalorder %s742_s15, 0 }
  0x2d   : > { %p857_p5 = por %p106_p2, %p34_p12  ;;  %p548_p10 = scmp.lt.s32.totalorder %s742_s15, 2 }
  0x2e   : > { %s863_s11 = scalar_select %p25_p13, %s738_s14, %s27_s8  }
  0x2f   : > { %s984_s10 = scalar_select %p857_p5, 1, 0 }
  0x30   : > { %p36_p3 = por %p35_p0, %p34_p12  ;;  %s156_s17 = sand.u32 1, %s738_s14  }
  0x31   : > { %s470_s21 = sshll.u32 %s156_s17, 4  ;;  %s488_s22 = sshll.u32 %s742_s15, 8 }
  0x32   : > { %s870_s25 = scalar_lea.hbm %s972_s0, %s488_s22  ;;  %s160_s26 = scalar_lea.vmem [#allocation2], %s470_s21 }
  0x33   : > { %s167_s29 = sshll.u32 %s160_s26, 4  ;;  %p874_p2 = pnand %p548_p10, %p36_p3  ;;  %s872_s29 = int_to_ptr.vmem [resolvable:$true] %s167_s29 }
  0x34   : > { %s878_s4 = scalar_lea.sflag [#allocation3], %s156_s17  ;;  %s646_s5 = scalar_lea.hbm %s870_s25, 256 }
  0x35   : > { %p647_p11 = scmp.ne.s32.totalorder %s870_s25, %s646_s5  ;;  %p648_p7 = pneg %p874_p2 }
  0x36   : > { %s651_s9 = scalar_lea.hbm %s972_s0, 512  ;;  %p652_p13 = scmp.lt.s32.totalorder %s870_s25, %s972_s0 }
  0x37   : > { %p649_p9 = pnand %p648_p7, %p647_p11  ;;  %p653_p0 = scmp.lt.s32.totalorder %s651_s9, %s646_s5 }
  0x39   : > { %p650_p12 = pneg %p649_p9  ;;  %p654_p10 = por %p653_p0, %p652_p13 }
  0x3b   : > { %p655_p3 = pnand %p654_p10, %p650_p12 }
  0x3d   : > { %658 = shalt.err (!%p655_p3)
}
  0x3e   : > { %s659_s17 = scalar_lea.vmem %s872_s29, 256  ;;  %s748_s23 = smov [#allocation2]  }
  0x3f   : > { %p660_p1 = scmp.ne.s32.totalorder %s872_s29, %s659_s17  ;;  %s664_s24 = sshll.u32 %s748_s23, 4  ;;  %s665_s24 = int_to_ptr.vmem [resolvable:$false] %s664_s24 }
  0x40   : > { %s666_s26 = scalar_lea.vmem %s665_s24, 512  ;;  %p667_p9 = scmp.lt.s32.totalorder %s872_s29, %s665_s24 }
  0x41   : > { %p662_p6 = pnand %p660_p1, %p648_p7  ;;  %p668_p5 = scmp.lt.s32.totalorder %s666_s26, %s659_s17 }
  0x43   : > { %p663_p11 = pneg %p662_p6  ;;  %p669_p4 = por %p668_p5, %p667_p9 }
  0x45   : > { %p670_p8 = pnand %p669_p4, %p663_p11 }
  0x47   : > { %673 = shalt.err (!%p670_p8)
}
  0x48   : > { %541 = dma.hbm_to_vmem [thread:$0]  (!%p874_p2), %s870_s25, 256, %s872_s29, %s878_s4, %s746_s27, %s746_s27, %s747_s28  }
  0x49   : > { %p986_p1 = scmp.ne.s32.totalorder %s982_s20, 0 }
  0x4a   : > { %s905_s5 = sand.u32 (!%p986_p1), 1, %s734_s13   ;;  %p987_p4 = scmp.ne.s32.totalorder (!%p986_p1), %s980_s18, 0 }
  0x4b   : > { %179 = sbr.rel (%p986_p1) target bundleno = 624 (0x270), region = 32  ;;  %s474_s6 = sshll.u32 (!%p986_p1), %s905_s5, 4 }
  0x4c   : > { %s182_s8 = scalar_lea.sflag (!%p986_p1), [#allocation3], %s905_s5  ;;  %s185_s30 = scalar_lea.vmem (!%p986_p1), [#allocation2], %s474_s6 }
  0x50   : > { %717 = dma.done.wait (%p987_p4), %s182_s8, 256  }
  0x51   : > { %719 = vsyncadd (%p987_p4), %s182_s8, 4294967040  ;;  %p988_p6 = scmp.eq.s32.totalorder %s793_s16, 0 }
  0x53   : > { %721 = dma.done.wait (%p988_p6), [#allocation6], 1088   ;;  %p989_p8 = pmov %p988_p6 }
  0x54   : > { %v227_v0 = vld [vmem:[#allocation5 + $0x38] sm:$0xff]  ;;  %v226_v1 = vld [vmem:[#allocation5 + $0x30] sm:$0xff]  ;;  %vm233_vm0 = vcmask 523264   ;;  %v225_v2 = vld [vmem:[#allocation5 + $0x28] sm:$0xff]  ;;  %s489_s18 = sshll.u32 %s793_s16, 8  ;;  %s215_s20 = scalar_lea.vmem [#allocation8], %s474_s6 }
  0x55   : > { %723 = vsyncadd (%p989_p8), [#allocation6], 4294966208  ;;  %500 = vmatprep.subr.mxu0 %v227_v0  ;;  %v218_v3 = vld [vmem:[%s185_s30] sm:$0xff]  ;;  %v223_v5 = vld [vmem:[#allocation5 + $0x18] sm:$0xff]  ;;  %s373_s27 = sshll.u32 %s215_s20, 4  ;;  %s927_s29 = scalar_lea.hbm %s975_s3, %s489_s18  ;;  %s929_s27 = int_to_ptr.vmem [resolvable:$true] %s373_s27 }
  0x56   : > { %501 = vmatpush3.msra.mxu0 %v227_v0  ;;  %516 = vmatprep.mubr.msk.f32.mxu0 %vm233_vm0, %v218_v3  ;;  %v224_v4 = vld [vmem:[#allocation5 + $0x20] sm:$0xff]  ;;  %v222_v6 = vld [vmem:[#allocation5 + $0x10] sm:$0xff]  ;;  %v221_v7 = vld [vmem:[#allocation5 + $0x8] sm:$0xff]  ;;  %s360_s4 = scalar_lea.sflag [#allocation4], %s905_s5  ;;  %s674_s9 = scalar_lea.vmem %s929_s27, 256 }
  0x57   : > { %502 = vmatprep.subr.mxu0 %v226_v1  ;;  %v220_v8 = vld [vmem:[#allocation5] sm:$0xff]  ;;  %v219_v9 = vld [vmem:[%s185_s30 + $0x8] sm:$0xff]  ;;  %p675_p5 = scmp.ne.s32.totalorder %s929_s27, %s674_s9  ;;  %p990_p2 = scmp.ne.s32.totalorder %s984_s10, 0 }
  0x58   : > { %503 = vmatpush3.msra.mxu0 %v226_v1  ;;  %v478_v11 = vld [vmem:[#allocation7] ss:$0 sm:$0xff]  ;;  %v481_v36 = vld [vmem:[#allocation7 + $0x1] ss:$0 sm:$0xff]  ;;  %v482_v38 = vld [vmem:[#allocation7 + $0x2] ss:$0 sm:$0xff] }
  0x59   : > { %504 = vmatprep.subr.mxu0 %v225_v2  ;;  %p676_p7 = pnand %p675_p5, %p990_p2  ;;  %s749_s16 = smov [#allocation8]  }
  0x5a   : > { %505 = vmatpush3.msra.mxu0 %v225_v2  ;;  %s678_s21 = sshll.u32 %s749_s16, 4  ;;  %s679_s21 = int_to_ptr.vmem [resolvable:$false] %s678_s21 }
  0x5b   : > { %506 = vmatprep.subr.mxu0 %v224_v4  ;;  %p677_p12 = pneg %p676_p7  ;;  %s680_s22 = scalar_lea.vmem %s679_s21, 512 }
  0x5c   : > { %507 = vmatpush3.msra.mxu0 %v224_v4  ;;  %p681_p13 = scmp.lt.s32.totalorder %s929_s27, %s679_s21  ;;  %p682_p0 = scmp.lt.s32.totalorder %s680_s22, %s674_s9 }
  0x5d   : > { %508 = vmatprep.subr.mxu0 %v223_v5 }
  0x5e   : > { %509 = vmatpush3.msra.mxu0 %v223_v5  ;;  %p683_p10 = por %p682_p0, %p681_p13 }
  0x5f   : > { %510 = vmatprep.subr.mxu0 %v222_v6 }
  0x60   : > { %511 = vmatpush3.msra.mxu0 %v222_v6  ;;  %p684_p3 = pnand %p683_p10, %p677_p12 }
  0x61   : > { %512 = vmatprep.subr.mxu0 %v221_v7 }
  0x62   : > { %513 = vmatpush3.msra.mxu0 %v221_v7 }
  0x63   : > { %514 = vmatprep.subr.mxu0 %v220_v8 }
  0x64   : > { %515 = vmatpush3.msra.mxu0 %v220_v8 }
  0x65   : > { %517 = vmatmul.mubr.msk.f32.vlgmr.msra.gmra.mxu0 %vm233_vm0, %v219_v9 }
 0x125   : > { %v518_v10 = vpop.f32.mrf.mxu0 }
 0x126   : > { %v312_v14 = vadd.f32 %v518_v10, %v478_v11 }
 0x127   : > { %v306_v12 = vpop.f32.mrf.mxu0 }
 0x128   : > { %v307_v13 = vadd.f32 %v478_v11, %v306_v12 }
 0x12a   : > { %315 = vadd.xlane.f32.xlu0 %v307_v13 }
 0x12e   : > { %317 = vadd.xlane.f32.xlu0 %v312_v14 }
 0x1b3   : > { %v316_v15 = vpop.xlane.xlu0 %315 }
 0x1b4   : > { %v319_v16 = vmul.f32 0.03125, %v316_v15 }
 0x1b6   : > { %v321_v17 = vsub.f32 %v307_v13, %v319_v16  ;;  %v329_v23 = vmul.f32 %v319_v16, %v319_v16 }
 0x1b7   : > { %v318_v18 = vpop.xlane.xlu0 %317 }
 0x1b8   : > { %v320_v19 = vmul.f32 0.03125, %v318_v18  ;;  %v323_v20 = vmul.f32 %v321_v17, %v321_v17  ;;  %v331_v25 = vmul.f32 96.0, %v329_v23 }
 0x1ba   : > { %v322_v21 = vsub.f32 %v312_v14, %v320_v19  ;;  %325 = vadd.xlane.f32.xlu1 %v323_v20  ;;  %v330_v24 = vmul.f32 %v320_v19, %v320_v19 }
 0x1bc   : > { %v324_v22 = vmul.f32 %v322_v21, %v322_v21  ;;  %v332_v28 = vmul.f32 96.0, %v330_v24 }
 0x1be   : > { %327 = vadd.xlane.f32.xlu1 %v324_v22 }
 0x243   : > { %v326_v26 = vpop.xlane.xlu1 %325 }
 0x244   : > { %v333_v27 = vsub.f32 %v326_v26, %v331_v25 }
 0x246   : > { %v335_v29 = vmul.f32 0.03125, %v333_v27 }
 0x247   : > { %v328_v30 = vpop.xlane.xlu1 %327 }
 0x248   : > { %v337_v31 = vadd.f32 1e-05, %v335_v29  ;;  %v334_v32 = vsub.f32 %v328_v30, %v332_v28 }
 0x24a   : > { %590 = vrsqrt.f32 %v337_v31  ;;  %v336_v33 = vmul.f32 0.03125, %v334_v32 }
 0x24c   : > { %v338_v34 = vadd.f32 1e-05, %v336_v33 }
 0x24e   : > { %592 = vrsqrt.f32 %v338_v34 }
 0x257   : > { %v591_v35 = vpop.eup %590 }
 0x258   : > { %v341_v37 = vmul.f32 %v591_v35, %v321_v17 }
 0x25a   : > { %v348_v39 = vmul.f32 %v481_v36, %v341_v37 }
 0x25b   : > { %v593_v40 = vpop.eup %592 }
 0x25c   : > { %v342_v41 = vmul.f32 %v593_v40, %v322_v21  ;;  %v355_v42 = vadd.f32 %v482_v38, %v348_v39 }
 0x25e   : > { %v349_v43 = vmul.f32 %v481_v36, %v342_v41  ;;  %357 = vst [vmem:[%s215_s20] sm:$0xff] %v355_v42 }
 0x260   : > { %v356_v44 = vadd.f32 %v482_v38, %v349_v43 }
 0x262   : > { %358 = vst [vmem:[%s215_s20 + $0x8] sm:$0xff] %v356_v44 }
 0x263   : > { %687 = shalt.err (!%p684_p3)
}
 0x264   : > { %s688_s17 = scalar_lea.hbm %s927_s29, 256  ;;  %s692_s26 = scalar_lea.hbm %s975_s3, 512 }
 0x265   : > { %p689_p11 = scmp.ne.s32.totalorder %s927_s29, %s688_s17  ;;  %p693_p4 = scmp.lt.s32.totalorder %s927_s29, %s975_s3 }
 0x266   : > { %p694_p6 = scmp.lt.s32.totalorder %s692_s26, %s688_s17 }
 0x267   : > { %p690_p9 = pnand %p689_p11, %p990_p2 }
 0x268   : > { %p695_p8 = por %p694_p6, %p693_p4 }
 0x269   : > { %p691_p1 = pneg %p690_p9 }
 0x26b   : > { %p696_p5 = pnand %p695_p8, %p691_p1 }
 0x26d   : > { %699 = shalt.err (!%p696_p5)
}
 0x26e   : > { %s750_s30 = smov 128   ;;  %s751_s18 = smov 8  }
 0x26f   : > { %529 = dma.vmem_to_hbm [thread:$0]  (%p990_p2), %s929_s27, 256, %s927_s29, %s360_s4, %s750_s30, %s750_s30, %s751_s18  }
 0x270 PF: > { %s388_s20 = sand.u32 1, %s730_s12   ;;  %p991_p7 = scmp.ne.s32.totalorder %s981_s19, 0 }
 0x271   : > { %p992_p12 = scmp.ge.s32.totalorder %s742_s15, 2  ;;  %s389_s28 = scalar_lea.sflag [#allocation4], %s388_s20 }
 0x273   : > { %p543_p13 = pnand %p992_p12, %p991_p7 }
 0x275   : > { %p544_p0 = pneg %p543_p13 }
 0x277   : > { %725 = dma.done.wait (%p544_p0), %s389_s28, 256  }
 0x278   : > { %727 = vsyncadd (%p544_p0), %s389_s28, 4294967040  ;;  %p17_p10 = scmp.ge.s32.totalorder %s847_s7, 4   ;;  %s993_s12 = smov %s734_s13 }
 0x279   : > { %s994_s13 = smov %s738_s14  ;;  %s995_s14 = smov %s863_s11 }
 0x27a   : > { %s996_s15 = smov %s847_s7  ;;  %19 = sbr.rel (!%p17_p10) target bundleno = 6 (0x6), region = 85 }
 0x27f   :  { %394 = vsyncpa [#allocation3], 1 }
 0x280   :  { %396 = vsyncpa [#allocation3 + $0x1], 1 }
 0x281   :  { %397 = vsyncpa [#allocation6], 1 }
 0x282   :  { %398 = vsyncpa [#allocation4], 1 }
 0x283   :  { %400 = vsyncpa [#allocation4 + $0x1], 1 }

</bundles_post_ra>
